<compile_context>
chip_gen: v7x
topology: tpu7x:2x2x1
jax: 0.10.0
libtpu: 0.0.40
codegen_flags: <defaults>
</compile_context>

<pallas_src>
import jax
import jax.numpy as jnp
from jax.experimental import pallas as pl
from jax.experimental.pallas import tpu as pltpu

LANE = 128      # vreg lane width
SUBLANE = 8     # vreg sublane height
VMEM_BUDGET = 40 * 1024 * 1024   # keep buffers well under v7x's 64 MiB physical VMEM


def _round_up(x, m):
    return (x + m - 1) // m * m


def _dueling_kernel(x_ref, w_ref, b_ref, q_ref):
    # In-kernel bf16 cast (hidden under the x DMA), one MXU pass with f32
    # accumulation, one f32 bias add, cast on store.
    x = x_ref[...].astype(w_ref.dtype)
    acc = jnp.dot(x, w_ref[...], preferred_element_type=jnp.float32)
    q_ref[...] = (acc + b_ref[...]).astype(q_ref.dtype)


def prepare_dueling_params(wv, bv, wa, ba, *, compute_dtype=jnp.bfloat16):
    """Fold V + A - mean_a(A) into one fused linear head (call ONCE, not per step).

    wv: (1, D), bv: (1,), wa: (A, D), ba: (A,)  -- PyTorch (out, in) Linear layout.
    Returns:
      w_fused: (D, A_pad) compute_dtype, action dim zero-padded to a multiple of 128
      b_fused: (1, A_pad) float32
    """
    A, D = wa.shape
    wa = wa.astype(jnp.float32)
    ba = ba.astype(jnp.float32)
    wv = wv.astype(jnp.float32)
    bv = bv.astype(jnp.float32)

    # Exact algebraic fusion of the dueling aggregation.
    w_f = (wa - jnp.mean(wa, axis=0, keepdims=True) + wv).T          # (D, A)
    b_f = (ba - jnp.mean(ba) + bv).reshape(1, A)                     # (1, A)

    a_pad = _round_up(A, LANE)
    w_f = jnp.pad(w_f, ((0, 0), (0, a_pad - A)))
    b_f = jnp.pad(b_f, ((0, 0), (0, a_pad - A)))
    return w_f.astype(compute_dtype), b_f.astype(jnp.float32)


def _pick_batch_tile(B, D, a_pad, x_itemsize, out_itemsize, tile_b):
    # Aim for >= 2 tiles when possible (both v7x TensorCores); sublane aligned.
    tb = min(tile_b, _round_up(max(pl.cdiv(B, 2), 1), SUBLANE))
    tb = max(SUBLANE, _round_up(tb, SUBLANE))

    def footprint(t):
        return (2 * t * D * x_itemsize           # x tiles (double-buffered)
                + 2 * t * a_pad * out_itemsize   # out tiles (double-buffered)
                + D * a_pad * 2 + a_pad * 4)     # resident fused weight + bias

    while tb > SUBLANE and footprint(tb) > VMEM_BUDGET:
        tb = max(SUBLANE, _round_up(tb // 2, SUBLANE))
    if tb >= B:
        tb = B   # single full-extent block: always layout-legal, zero padding
    return tb


def dueling_forward(features, w_fused, b_fused, *, num_actions,
                    tile_b=2048, out_dtype=jnp.bfloat16):
    """features: (B, D) in any float dtype; w_fused/b_fused from prepare_dueling_params.
       Returns Q: (B, num_actions) in out_dtype."""
    B, D = features.shape
    d_w, a_pad = w_fused.shape
    assert d_w == D and a_pad % LANE == 0 and num_actions <= a_pad

    tb = _pick_batch_tile(B, D, a_pad,
                          jnp.dtype(features.dtype).itemsize,
                          jnp.dtype(out_dtype).itemsize,
                          tile_b)
    grid = (pl.cdiv(B, tb),)   # partial last block handled by Pallas masking

    q = pl.pallas_call(
        _dueling_kernel,
        out_shape=jax.ShapeDtypeStruct((B, a_pad), out_dtype),
        grid=grid,
        in_specs=[
            pl.BlockSpec((tb, D), lambda i: (i, 0)),        # x tile, pipelined over batch
            pl.BlockSpec((D, a_pad), lambda i: (0, 0)),     # fused weight, VMEM-resident
            pl.BlockSpec((1, a_pad), lambda i: (0, 0)),     # fused bias, VMEM-resident
        ],
        out_specs=pl.BlockSpec((tb, a_pad), lambda i: (i, 0)),
        compiler_params=pltpu.CompilerParams(
            dimension_semantics=("parallel",),              # shard batch tiles across TCs
            vmem_limit_bytes=48 * 1024 * 1024,              # <= v7x 64 MiB physical
        ),
    )(features, w_fused, b_fused)

    # Drop only the zero action-padding columns (the batch was never padded).
    return q[:, :num_actions]


if __name__ == "__main__":
    key = jax.random.PRNGKey(0)
    B, D, A = 2, 32, 8   # batch, feature dim, num actions

    k1, k2, k3, k4, k5 = jax.random.split(key, 5)
    features = jax.random.normal(k1, (B, D), dtype=jnp.float32)
    # Synthetic "Linear" parameters in PyTorch (out, in) layout.
    wv = jax.random.normal(k2, (1, D), dtype=jnp.float32) * 0.1
    bv = jax.random.normal(k3, (1,), dtype=jnp.float32) * 0.1
    wa = jax.random.normal(k4, (A, D), dtype=jnp.float32) * 0.1
    ba = jax.random.normal(k5, (A,), dtype=jnp.float32) * 0.1

    # Parameter folding done once (not per forward call).
    w_f, b_f = prepare_dueling_params(wv, bv, wa, ba)

    def reference(x):
        value = x @ wv.T + bv
        adv = x @ wa.T + ba
        return value + adv - jnp.mean(adv, axis=1, keepdims=True)

    # Small-batch path (single full-extent block).
    q = jax.block_until_ready(dueling_forward(features, w_f, b_f, num_actions=A))
    assert q.shape == (B, A)
    assert jnp.allclose(q.astype(jnp.float32), reference(features),
                        atol=3e-2, rtol=3e-2), "mismatch vs f32 reference"

    # Tighter check vs a reference using the same bf16-quantized operands/output.
    x_q = features.astype(jnp.bfloat16).astype(jnp.float32)
    q_ref_q = (jnp.dot(x_q, w_f.astype(jnp.float32),
                       precision=jax.lax.Precision.HIGHEST) + b_f)[:, :A]
    q_ref_q = q_ref_q.astype(jnp.bfloat16).astype(jnp.float32)
    assert jnp.allclose(q.astype(jnp.float32), q_ref_q,
                        atol=1e-2, rtol=1e-2), "mismatch vs quantized reference"

    # Ragged-batch path: B not a multiple of the tile -> partial last block,
    # exercising the no-pad cdiv grid.
    B2 = 20
    features2 = jax.random.normal(jax.random.PRNGKey(1), (B2, D), dtype=jnp.float32)
    q2 = jax.block_until_ready(
        dueling_forward(features2, w_f, b_f, num_actions=A, tile_b=16))
    assert q2.shape == (B2, A)
    assert jnp.allclose(q2.astype(jnp.float32), reference(features2),
                        atol=3e-2, rtol=3e-2), "mismatch on ragged batch"

    print("KERNEL_OK")
</pallas_src>

<mosaic_0001>
module attributes {stable_mosaic.version = 11 : i64} {
  func.func @_dueling_kernel(%arg0: i32, %arg1: memref<2x32xf32, #tpu.memory_space<vmem>>, %arg2: memref<32x128xbf16, #tpu.memory_space<vmem>>, %arg3: memref<1x128xf32, #tpu.memory_space<vmem>>, %arg4: memref<2x128xbf16, #tpu.memory_space<vmem>>) attributes {dimension_semantics = [#tpu.dimension_semantics<parallel>], iteration_bounds = array<i64: 1>, scalar_prefetch = 0 : i64, scratch_operands = 0 : i64, tpu.core_type = #tpu.core_type<tc>, window_params = [{transform_indices = @transform_0, window_bounds = array<i64: 2, 32>}, {pipeline_mode = #tpu.pipeline_mode<synchronous>, transform_indices = @transform_1, window_bounds = array<i64: 32, 128>}, {pipeline_mode = #tpu.pipeline_mode<synchronous>, transform_indices = @transform_2, window_bounds = array<i64: 1, 128>}, {transform_indices = @transform_3, window_bounds = array<i64: 2, 128>}]} {
    %c0 = arith.constant 0 : index
    %c0_0 = arith.constant 0 : index
    %0 = vector.load %arg1[%c0, %c0_0] : memref<2x32xf32, #tpu.memory_space<vmem>>, vector<2x32xf32>
    %1 = arith.truncf %0 : vector<2x32xf32> to vector<2x32xbf16>
    %c0_1 = arith.constant 0 : index
    %c0_2 = arith.constant 0 : index
    %2 = vector.load %arg2[%c0_1, %c0_2] : memref<32x128xbf16, #tpu.memory_space<vmem>>, vector<32x128xbf16>
    %cst = arith.constant dense<0.000000e+00> : vector<2x128xf32>
    %3 = tpu.matmul %1, %2, %cst {dimension_numbers = #tpu.dot_dimension_numbers<[1], [0], [0], [1], [0, 0, 1, 1], [], []>} : vector<2x32xbf16>, vector<32x128xbf16>, vector<2x128xf32> -> vector<2x128xf32>
    %c0_3 = arith.constant 0 : index
    %c0_4 = arith.constant 0 : index
    %4 = vector.load %arg3[%c0_3, %c0_4] : memref<1x128xf32, #tpu.memory_space<vmem>>, vector<1x128xf32>
    %5 = vector.broadcast %4 : vector<1x128xf32> to vector<2x128xf32>
    %6 = arith.addf %3, %5 : vector<2x128xf32>
    %7 = arith.truncf %6 : vector<2x128xf32> to vector<2x128xbf16>
    %c0_5 = arith.constant 0 : index
    %c0_6 = arith.constant 0 : index
    %8 = vector.load %arg4[%c0_5, %c0_6] : memref<2x128xbf16, #tpu.memory_space<vmem>>, vector<2x128xbf16>
    tpu.vector_store %arg4[%c0_5, %c0_6], %7 {strides = array<i32>} : memref<2x128xbf16, #tpu.memory_space<vmem>>, vector<2x128xbf16>,
    return
  }
  func.func @transform_0(%arg0: i32) -> (i32, i32) {
    %c0_i32 = arith.constant 0 : i32
    %c0_i32_0 = arith.constant 0 : i32
    return %arg0, %c0_i32 : i32, i32
  }
  func.func @transform_1(%arg0: i32) -> (i32, i32) {
    %c0_i32 = arith.constant 0 : i32
    %c0_i32_0 = arith.constant 0 : i32
    %c0_i32_1 = arith.constant 0 : i32
    return %c0_i32, %c0_i32_0 : i32, i32
  }
  func.func @transform_2(%arg0: i32) -> (i32, i32) {
    %c0_i32 = arith.constant 0 : i32
    %c0_i32_0 = arith.constant 0 : i32
    %c0_i32_1 = arith.constant 0 : i32
    return %c0_i32, %c0_i32_0 : i32, i32
  }
  func.func @transform_3(%arg0: i32) -> (i32, i32) {
    %c0_i32 = arith.constant 0 : i32
    %c0_i32_0 = arith.constant 0 : i32
    return %arg0, %c0_i32 : i32, i32
  }
}

</mosaic_0001>

<bundles_post_ra>
// kernel: tpu_custom_call.1
= control target key start
LH: loop header
LB: loop body
LE: loop exit
PB: predicated region body
PF: predicated region fallthrough
CT: control target
= control target key end

     0   :  { %8 = vsyncpa [#allocation3], 0  ;;  %s298_s0 = inlined_call_operand.hbm [shape: f32[2,32], index: 0, kind: input, shape index: {}]   ;;  %s299_s1 = inlined_call_operand.hbm [shape: bf16[32,128], index: 1, kind: input, shape index: {}]   ;;  %s300_s2 = inlined_call_operand.vmem [shape: f32[1,128], index: 2, kind: input, shape index: {}]   ;;  %s301_s3 = inlined_call_operand.hbm [shape: bf16[2,128], index: 3, kind: output, shape index: {}]  }
   0x1   :  { %9 = vsyncpa [#allocation6], 0 }
   0x2   :  { %10 = vsyncpa [#allocation4], 0  ;;  %s225_s12 = smov [#allocation2]   ;;  %s226_s14 = smov [#allocation5]  }
   0x3   :  { %s17_s13 = sshll.u32 %s225_s12, 4  ;;  %s26_s15 = sshll.u32 %s226_s14, 4  ;;  %s18_s13 = int_to_ptr.vmem [resolvable:$true] %s17_s13  ;;  %s252_s15 = int_to_ptr.vmem [resolvable:$true] %s26_s15 }
   0x4   :  { %s153_s18 = scalar_lea.hbm %s298_s0, 32 }
   0x5   :  { %p154_p0 = scmp.ne.s32.totalorder %s298_s0, %s153_s18  ;;  %p157_p1 = scmp.lt.u32.totalorder %s153_s18, %s298_s0 }
   0x7   :  { %p159_p2 = pnand %p157_p1, %p154_p0 }
   0x9   :  { %162 = shalt.err (!%p159_p2)
}
   0xa   :  { %s163_s23 = scalar_lea.vmem %s18_s13, 32  ;;  %p168_p4 = scmp.lt.s32.totalorder %s18_s13, %s18_s13 }
   0xb   :  { %p164_p3 = scmp.ne.s32.totalorder %s18_s13, %s163_s23  ;;  %p169_p5 = scmp.lt.s32.totalorder %s163_s23, %s163_s23 }
   0xd   :  { %p170_p6 = por %p169_p5, %p168_p4 }
   0xf   :  { %p171_p7 = pnand %p170_p6, %p164_p3 }
  0x11   :  { %174 = shalt.err (!%p171_p7)
}
  0x12   :  { %20 = dma.hbm_to_vmem [thread:$0]  %s298_s0, 32, %s18_s13, [#allocation3]  }
  0x13   :  { %s175_s28 = scalar_lea.hbm %s299_s1, 256 }
  0x14   :  { %p176_p8 = scmp.ne.s32.totalorder %s299_s1, %s175_s28  ;;  %p179_p9 = scmp.lt.u32.totalorder %s175_s28, %s299_s1 }
  0x16   :  { %p181_p10 = pnand %p179_p9, %p176_p8 }
  0x18   :  { %184 = shalt.err (!%p181_p10)
}
  0x19   :  { %s185_s6 = scalar_lea.vmem %s252_s15, 256  ;;  %p190_p12 = scmp.lt.s32.totalorder %s252_s15, %s252_s15 }
  0x1a   :  { %p186_p11 = scmp.ne.s32.totalorder %s252_s15, %s185_s6  ;;  %p191_p13 = scmp.lt.s32.totalorder %s185_s6, %s185_s6 }
  0x1c   :  { %p192_p0 = por %p191_p13, %p190_p12 }
  0x1e   :  { %p193_p1 = pnand %p192_p0, %p186_p11 }
  0x20   :  { %196 = shalt.err (!%p193_p1)
}
  0x21   :  { %s227_s0 = smov 64   ;;  %s228_s7 = smov 4  }
  0x22   :  { %32 = dma.hbm_to_vmem [thread:$0]  %s299_s1, 256, %s252_s15, [#allocation6], %s227_s0, %s227_s0, %s228_s7  }
  0x23   :  { %219 = dma.done.wait [#allocation3], 32  }
  0x24   :  { %220 = vsyncadd [#allocation3], 4294967264 }
  0x25   :  { %221 = dma.done.wait [#allocation6], 256  }
  0x26   :  { %222 = vsyncadd [#allocation6], 4294967040  ;;  %v229_v0 = vmov 0.0   ;;  %vm230_vm0 = vmmov 0   ;;  %v151_v1 = vld [vmem:[#allocation5] sm:$0xff]   ;;  %v152_v2 = vld [vmem:[#allocation5 + $0x8] sm:$0xff]  }
  0x27   :  { %136 = vmatprep.subr.bf16.mxu0 %v229_v0  ;;  %140 = vmatprep.mubr.msk.bf16.mxu0 %vm230_vm0, %v229_v0  ;;  %v42_v3 = vld [vmem:[#allocation2] sm:$0x3]  ;;  %vm67_vm1 = vcmask 261120   ;;  %s231_s1 = smov [#allocation7]  }
  0x28   :  { %137 = vmatpush3.bf16.msra.mxu0 %v151_v1  ;;  %v43_v4 = vpack.c.bf16 %v42_v3, %v42_v3  ;;  %v129_v5 = vld [vmem:[%s300_s2] ss:$0 sm:$0xff]  ;;  %s119_s12 = sshll.u32 %s231_s1, 4  ;;  %s120_s12 = int_to_ptr.vmem [resolvable:$true] %s119_s12 }
  0x29   :  { %138 = vmatprep.subr.bf16.mxu0 %v229_v0  ;;  %s197_s13 = scalar_lea.vmem %s120_s12, 16  ;;  %s201_s14 = scalar_lea.vmem %s120_s12, 32 }
  0x2a   :  { %p198_p2 = scmp.ne.s32.totalorder %s120_s12, %s197_s13  ;;  %p202_p3 = scmp.lt.s32.totalorder %s120_s12, %s120_s12 }
  0x2b   :  { %p203_p4 = scmp.lt.s32.totalorder %s201_s14, %s197_s13 }
  0x2c   :  { %139 = vmatpush3.bf16.msra.mxu0 %v152_v2 }
  0x2d   :  { %p204_p5 = por %p203_p4, %p202_p3 }
  0x2f   :  { %141 = vmatmul.mubr.msk.bf16.vlgmr.msra.gmra.mrb[0].mxu0 %vm67_vm1, %v43_v4  ;;  %p205_p6 = pnand %p204_p5, %p198_p2 }
 0x102   :  { %v105_v6 = vpop.f32.mrb[0].mxu0 }
 0x103   :  { %v106_v7 = vadd.f32 %v129_v5, %v105_v6  ;;  %v142_v8 = vpop.f32.mrb[1].mxu0 }
 0x104   :  { %v108_v9 = vpop.f32.mrb[2].mxu0 }
 0x105   :  { %v111_v10 = vpack.c.bf16 %v106_v7, %v106_v7  ;;  %v143_v11 = vpop.f32.mrb[3].mxu0 }
 0x107   :  { %112 = vst [vmem:[#allocation7] sm:$0x1] %v111_v10 }
 0x108   :  { %208 = shalt.err (!%p205_p6)
}
 0x109   :  { %s209_s16 = scalar_lea.hbm %s301_s3, 16 }
 0x10a   :  { %p210_p7 = scmp.ne.s32.totalorder %s301_s3, %s209_s16  ;;  %p213_p8 = scmp.lt.u32.totalorder %s209_s16, %s301_s3 }
 0x10c   :  { %p215_p9 = pnand %p213_p8, %p210_p7 }
 0x10e   :  { %218 = shalt.err (!%p215_p9)
}
 0x10f   :  { %122 = dma.vmem_to_hbm [thread:$0]  %s120_s12, 16, %s301_s3, [#allocation4]  }
 0x110   :  { %223 = dma.done.wait [#allocation4], 16  }
 0x111   :  { %224 = vsyncadd [#allocation4], 4294967280 }
 0x112   :  { %126 = vsyncpa [#allocation3], 1 }
 0x113   :  { %127 = vsyncpa [#allocation6], 1 }
 0x114   :  { %128 = vsyncpa [#allocation4], 1 }

</bundles_post_ra>
